<compile_context>
chip_gen: v5e
topology: v5e:2x2
jax: 0.10.0
libtpu: 0.0.40
codegen_flags: <defaults>
</compile_context>

<pallas_src>
import functools

import jax
import jax.numpy as jnp
from jax.experimental import pallas as pl
from jax.experimental.pallas import tpu as pltpu

# Logical (PyTorch) sizes.
IN_F, H1, H2, OUT_F = 29, 200, 100, 1
# Lane/sublane-padded sizes used inside the kernel.
IN_P, H1_P, H2_P = 32, 256, 128


def _round_up(n, m):
    return (n + m - 1) // m * m


def mlp_kernel(xt_ref, w1_ref, b1_ref, w2_ref, b2_ref, w3_ref, b3_ref, o_ref):
    """One batch tile. Activations are transposed: batch lives on the lane axis."""
    xt = xt_ref[...]                                               # (IN_P, tm)
    # layer 1: (H1_P, IN_P) @ (IN_P, tm) -> (H1_P, tm), f32 accumulation on MXU.
    h1 = jnp.dot(w1_ref[...], xt, preferred_element_type=jnp.float32)
    h1 = jnp.maximum(h1 + b1_ref[...], 0.0)                        # f32 bias + ReLU
    # layer 2: (H2_P, H1_P) @ (H1_P, tm) -> (H2_P, tm)
    h2 = jnp.dot(w2_ref[...], h1.astype(w2_ref.dtype),
                 preferred_element_type=jnp.float32)
    h2 = jnp.maximum(h2 + b2_ref[...], 0.0)
    # layer 3 (out_features = 1): VPU multiply + sublane reduce instead of an
    # N=1 MXU matmul; result lands directly in the lane-dense (1, tm) layout.
    y = jnp.sum(h2 * w3_ref[...], axis=0, keepdims=True) + b3_ref[...]
    o_ref[...] = y.astype(o_ref.dtype)


def interuption_model_forward(x, params, *, tm=1024, compute_dtype=jnp.bfloat16):
    """Fused forward. x: (B, 29) float32; params in PyTorch (out, in) layout.

    compute_dtype: bfloat16 recommended on v6e/v7x (accumulation is always f32);
    pass jnp.float32 for full f32 math.
    """
    B, F = x.shape
    assert F == IN_F

    # --- Batch tiling -------------------------------------------------------
    tm_req = max(128, _round_up(tm, 128))
    bpad128 = _round_up(B, 128)
    if bpad128 > tm_req:
        tm = tm_req                       # many tiles -> grid already >= 2
    else:
        n_tiles = bpad128 // 128
        # Single-tile batch: split into two equal tiles (zero extra padding)
        # when possible so the "parallel" batch axis can shard across the two
        # TensorCores on v7x; harmless (one extra grid step) on v5e/v6e.
        tm = bpad128 // 2 if (n_tiles >= 2 and n_tiles % 2 == 0) else bpad128
    bpad = _round_up(B, tm)
    grid = (bpad // tm,)

    cd = compute_dtype
    f32 = jnp.float32

    def pad2(a, rows, cols):
        return jnp.pad(a, ((0, rows - a.shape[0]), (0, cols - a.shape[1])))

    # Zero-pad weights/biases to lane-aligned shapes (biases stay f32).
    # Cheap, constant-shaped ops; under jit they fuse / are hoisted.
    w1p = pad2(params["w1"], H1_P, IN_P).astype(cd)                      # (256, 32)
    b1p = pad2(params["b1"].reshape(-1, 1), H1_P, 1).astype(f32)         # (256, 1)
    w2p = pad2(params["w2"], H2_P, H1_P).astype(cd)                      # (128, 256)
    b2p = pad2(params["b2"].reshape(-1, 1), H2_P, 1).astype(f32)         # (128, 1)
    w3p = pad2(params["w3"], OUT_F, H2_P).reshape(H2_P, 1).astype(f32)   # (128, 1)
    b3p = params["b3"].reshape(1, 1).astype(f32)                         # (1, 1)

    # Pad + transpose the input so the batch lives on the lane axis: (IN_P, bpad).
    xt = pad2(x, bpad, IN_P).astype(cd).T

    out_t = pl.pallas_call(
        mlp_kernel,
        out_shape=jax.ShapeDtypeStruct((1, bpad), jnp.float32),
        grid=grid,
        in_specs=[
            pl.BlockSpec((IN_P, tm), lambda i: (0, i)),        # x (batch tiled, lane-dense)
            pl.BlockSpec((H1_P, IN_P), lambda i: (0, 0)),      # w1 (VMEM-resident)
            pl.BlockSpec((H1_P, 1), lambda i: (0, 0)),         # b1
            pl.BlockSpec((H2_P, H1_P), lambda i: (0, 0)),      # w2
            pl.BlockSpec((H2_P, 1), lambda i: (0, 0)),         # b2
            pl.BlockSpec((H2_P, 1), lambda i: (0, 0)),         # w3 as a column
            pl.BlockSpec((1, 1), lambda i: (0, 0)),            # b3
        ],
        out_specs=pl.BlockSpec((1, tm), lambda i: (0, i)),     # lane-dense output
        compiler_params=pltpu.CompilerParams(
            dimension_semantics=("parallel",),
        ),
    )(xt, w1p, b1p, w2p, b2p, w3p, b3p)

    # (1, bpad) -> (bpad, 1) is a pure reshape; then drop batch padding.
    return out_t.reshape(bpad, 1)[:B]


def init_params(key):
    """PyTorch nn.Linear-style params: weight (out, in), bias (out,)."""
    ks = jax.random.split(key, 6)

    def linear_init(kw, kb, fan_in, fan_out):
        bound = 1.0 / jnp.sqrt(jnp.float32(fan_in))
        w = jax.random.uniform(kw, (fan_out, fan_in), jnp.float32, -bound, bound)
        b = jax.random.uniform(kb, (fan_out,), jnp.float32, -bound, bound)
        return w, b

    w1, b1 = linear_init(ks[0], ks[1], IN_F, H1)
    w2, b2 = linear_init(ks[2], ks[3], H1, H2)
    w3, b3 = linear_init(ks[4], ks[5], H2, OUT_F)
    return {"w1": w1, "b1": b1, "w2": w2, "b2": b2, "w3": w3, "b3": b3}


def reference_forward(x, params, compute_dtype=jnp.float32):
    """Pure-JAX reference mirroring the kernel's dtype scheme."""
    cd = compute_dtype
    h1 = jnp.dot(x.astype(cd), params["w1"].astype(cd).T,
                 preferred_element_type=jnp.float32) + params["b1"]
    h1 = jnp.maximum(h1, 0.0)
    h2 = jnp.dot(h1.astype(cd), params["w2"].astype(cd).T,
                 preferred_element_type=jnp.float32) + params["b2"]
    h2 = jnp.maximum(h2, 0.0)
    return jnp.dot(h2, params["w3"].T) + params["b3"]   # final layer in f32


if __name__ == "__main__":
    key = jax.random.PRNGKey(0)
    kx, kp = jax.random.split(key)
    params = init_params(kp)

    # Jit the wrapper so pad / transpose / slice fuse around the pallas_call.
    fwd = jax.jit(interuption_model_forward, static_argnames=("tm", "compute_dtype"))

    # 1) Small batch, f32 compute, tight tolerance.
    B = 8
    x = jax.random.normal(kx, (B, IN_F), jnp.float32)
    out_f32 = jax.block_until_ready(fwd(x, params, compute_dtype=jnp.float32))
    ref_f32 = reference_forward(x, params, compute_dtype=jnp.float32)
    assert out_f32.shape == (B, OUT_F)
    assert jnp.allclose(out_f32, ref_f32, atol=2e-3, rtol=2e-3), "f32 mismatch vs reference"

    # 2) Ragged batch, multi-step grid (tm=128 -> 3 steps), default bf16 compute.
    B2 = 300
    x2 = jax.random.normal(jax.random.fold_in(kx, 1), (B2, IN_F), jnp.float32)
    out_bf16 = jax.block_until_ready(fwd(x2, params, tm=128, compute_dtype=jnp.bfloat16))
    ref_bf16 = reference_forward(x2, params, compute_dtype=jnp.bfloat16)
    assert out_bf16.shape == (B2, OUT_F)
    assert jnp.allclose(out_bf16, ref_bf16, atol=2e-2, rtol=2e-2), "bf16 mismatch vs reference"

    # 3) Even-tile batch: single-tile split into 2 grid steps (megacore path).
    B3 = 256
    x3 = jax.random.normal(jax.random.fold_in(kx, 2), (B3, IN_F), jnp.float32)
    out3 = jax.block_until_ready(fwd(x3, params, compute_dtype=jnp.float32))
    ref3 = reference_forward(x3, params, compute_dtype=jnp.float32)
    assert out3.shape == (B3, OUT_F)
    assert jnp.allclose(out3, ref3, atol=2e-3, rtol=2e-3), "f32 (split-tile) mismatch"

    print("KERNEL_OK")
</pallas_src>

<mosaic_0001>
module attributes {stable_mosaic.version = 11 : i64} {
  func.func @mlp_kernel(%arg0: i32, %arg1: memref<32x128xf32, #tpu.memory_space<vmem>>, %arg2: memref<256x32xf32, #tpu.memory_space<vmem>>, %arg3: memref<256x1xf32, #tpu.memory_space<vmem>>, %arg4: memref<128x256xf32, #tpu.memory_space<vmem>>, %arg5: memref<128x1xf32, #tpu.memory_space<vmem>>, %arg6: memref<128x1xf32, #tpu.memory_space<vmem>>, %arg7: memref<1x1xf32, #tpu.memory_space<vmem>>, %arg8: memref<1x128xf32, #tpu.memory_space<vmem>>) attributes {dimension_semantics = [#tpu.dimension_semantics<parallel>], iteration_bounds = array<i64: 1>, scalar_prefetch = 0 : i64, scratch_operands = 0 : i64, tpu.core_type = #tpu.core_type<tc>, window_params = [{transform_indices = @transform_0, window_bounds = array<i64: 32, 128>}, {pipeline_mode = #tpu.pipeline_mode<synchronous>, transform_indices = @transform_1, window_bounds = array<i64: 256, 32>}, {pipeline_mode = #tpu.pipeline_mode<synchronous>, transform_indices = @transform_2, window_bounds = array<i64: 256, 1>}, {pipeline_mode = #tpu.pipeline_mode<synchronous>, transform_indices = @transform_3, window_bounds = array<i64: 128, 256>}, {pipeline_mode = #tpu.pipeline_mode<synchronous>, transform_indices = @transform_4, window_bounds = array<i64: 128, 1>}, {pipeline_mode = #tpu.pipeline_mode<synchronous>, transform_indices = @transform_5, window_bounds = array<i64: 128, 1>}, {pipeline_mode = #tpu.pipeline_mode<synchronous>, transform_indices = @transform_6, window_bounds = array<i64: 1, 1>}, {transform_indices = @transform_7, window_bounds = array<i64: 1, 128>}]} {
    %c0 = arith.constant 0 : index
    %c0_0 = arith.constant 0 : index
    %0 = vector.load %arg1[%c0, %c0_0] : memref<32x128xf32, #tpu.memory_space<vmem>>, vector<32x128xf32>
    %c0_1 = arith.constant 0 : index
    %c0_2 = arith.constant 0 : index
    %1 = vector.load %arg2[%c0_1, %c0_2] : memref<256x32xf32, #tpu.memory_space<vmem>>, vector<256x32xf32>
    %cst = arith.constant dense<0.000000e+00> : vector<256x128xf32>
    %2 = tpu.matmul %1, %0, %cst {dimension_numbers = #tpu.dot_dimension_numbers<[1], [0], [0], [1], [0, 0, 1, 1], [], []>} : vector<256x32xf32>, vector<32x128xf32>, vector<256x128xf32> -> vector<256x128xf32>
    %c0_3 = arith.constant 0 : index
    %c0_4 = arith.constant 0 : index
    %3 = vector.load %arg3[%c0_3, %c0_4] : memref<256x1xf32, #tpu.memory_space<vmem>>, vector<256x1xf32>
    %4 = vector.broadcast %3 : vector<256x1xf32> to vector<256x128xf32>
    %5 = arith.addf %2, %4 : vector<256x128xf32>
    %cst_5 = arith.constant 0.000000e+00 : f32
    %6 = vector.broadcast %cst_5 : f32 to vector<256x128xf32>
    %7 = arith.maximumf %5, %6 : vector<256x128xf32>
    %c0_6 = arith.constant 0 : index
    %c0_7 = arith.constant 0 : index
    %8 = vector.load %arg4[%c0_6, %c0_7] : memref<128x256xf32, #tpu.memory_space<vmem>>, vector<128x256xf32>
    %cst_8 = arith.constant dense<0.000000e+00> : vector<128x128xf32>
    %9 = tpu.matmul %8, %7, %cst_8 {dimension_numbers = #tpu.dot_dimension_numbers<[1], [0], [0], [1], [0, 0, 1, 1], [], []>} : vector<128x256xf32>, vector<256x128xf32>, vector<128x128xf32> -> vector<128x128xf32>
    %c0_9 = arith.constant 0 : index
    %c0_10 = arith.constant 0 : index
    %10 = vector.load %arg5[%c0_9, %c0_10] : memref<128x1xf32, #tpu.memory_space<vmem>>, vector<128x1xf32>
    %11 = vector.broadcast %10 : vector<128x1xf32> to vector<128x128xf32>
    %12 = arith.addf %9, %11 : vector<128x128xf32>
    %cst_11 = arith.constant 0.000000e+00 : f32
    %13 = vector.broadcast %cst_11 : f32 to vector<128x128xf32>
    %14 = arith.maximumf %12, %13 : vector<128x128xf32>
    %c0_12 = arith.constant 0 : index
    %c0_13 = arith.constant 0 : index
    %15 = vector.load %arg6[%c0_12, %c0_13] : memref<128x1xf32, #tpu.memory_space<vmem>>, vector<128x1xf32>
    %16 = vector.broadcast %15 : vector<128x1xf32> to vector<128x128xf32>
    %17 = arith.mulf %14, %16 : vector<128x128xf32>
    %cst_14 = arith.constant dense<0.000000e+00> : vector<128xf32>
    %18 = vector.multi_reduction <add>, %17, %cst_14 [0] : vector<128x128xf32> to vector<128xf32>
    %19 = vector.shape_cast %18 : vector<128xf32> to vector<1x128xf32>
    %c0_15 = arith.constant 0 : index
    %c0_16 = arith.constant 0 : index
    %20 = vector.load %arg7[%c0_15, %c0_16] : memref<1x1xf32, #tpu.memory_space<vmem>>, vector<1x1xf32>
    %21 = vector.broadcast %20 : vector<1x1xf32> to vector<1x128xf32>
    %22 = arith.addf %19, %21 : vector<1x128xf32>
    %c0_17 = arith.constant 0 : index
    %c0_18 = arith.constant 0 : index
    %23 = vector.load %arg8[%c0_17, %c0_18] : memref<1x128xf32, #tpu.memory_space<vmem>>, vector<1x128xf32>
    tpu.vector_store %arg8[%c0_17, %c0_18], %22 {strides = array<i32>} : memref<1x128xf32, #tpu.memory_space<vmem>>, vector<1x128xf32>,
    return
  }
  func.func @transform_0(%arg0: i32) -> (i32, i32) {
    %c0_i32 = arith.constant 0 : i32
    %c0_i32_0 = arith.constant 0 : i32
    return %c0_i32, %arg0 : i32, i32
  }
  func.func @transform_1(%arg0: i32) -> (i32, i32) {
    %c0_i32 = arith.constant 0 : i32
    %c0_i32_0 = arith.constant 0 : i32
    %c0_i32_1 = arith.constant 0 : i32
    return %c0_i32, %c0_i32_0 : i32, i32
  }
  func.func @transform_2(%arg0: i32) -> (i32, i32) {
    %c0_i32 = arith.constant 0 : i32
    %c0_i32_0 = arith.constant 0 : i32
    %c0_i32_1 = arith.constant 0 : i32
    return %c0_i32, %c0_i32_0 : i32, i32
  }
  func.func @transform_3(%arg0: i32) -> (i32, i32) {
    %c0_i32 = arith.constant 0 : i32
    %c0_i32_0 = arith.constant 0 : i32
    %c0_i32_1 = arith.constant 0 : i32
    return %c0_i32, %c0_i32_0 : i32, i32
  }
  func.func @transform_4(%arg0: i32) -> (i32, i32) {
    %c0_i32 = arith.constant 0 : i32
    %c0_i32_0 = arith.constant 0 : i32
    %c0_i32_1 = arith.constant 0 : i32
    return %c0_i32, %c0_i32_0 : i32, i32
  }
  func.func @transform_5(%arg0: i32) -> (i32, i32) {
    %c0_i32 = arith.constant 0 : i32
    %c0_i32_0 = arith.constant 0 : i32
    %c0_i32_1 = arith.constant 0 : i32
    return %c0_i32, %c0_i32_0 : i32, i32
  }
  func.func @transform_6(%arg0: i32) -> (i32, i32) {
    %c0_i32 = arith.constant 0 : i32
    %c0_i32_0 = arith.constant 0 : i32
    %c0_i32_1 = arith.constant 0 : i32
    return %c0_i32, %c0_i32_0 : i32, i32
  }
  func.func @transform_7(%arg0: i32) -> (i32, i32) {
    %c0_i32 = arith.constant 0 : i32
    %c0_i32_0 = arith.constant 0 : i32
    return %c0_i32, %arg0 : i32, i32
  }
}

</mosaic_0001>

<bundles_post_ra>
// kernel: interuption_model_forward.1
= control target key start
LH: loop header
LB: loop body
LE: loop exit
PB: predicated region body
PF: predicated region fallthrough
CT: control target
= control target key end

     0   :  { %v974_v0 = vmov 0   ;;  %vm256_vm0 = vcmask 261120   ;;  %s1539_s2 = inlined_call_operand.vmem [shape: f32[256,1], index: 2, kind: input, shape index: {}]   ;;  %s1540_s0 = inlined_call_operand.vmem [shape: f32[32,128], index: 0, kind: input, shape index: {}]   ;;  %s1541_s1 = inlined_call_operand.vmem [shape: f32[256,32], index: 1, kind: input, shape index: {}]   ;;  %s1542_s4 = inlined_call_operand.vmem [shape: f32[128,1], index: 4, kind: input, shape index: {}]   ;;  %s1543_s5 = inlined_call_operand.vmem [shape: f32[128,1], index: 5, kind: input, shape index: {}]   ;;  %s1544_s6 = inlined_call_operand.<no memory space> [shape: f32[1,1], index: 6, kind: input, shape index: {}]   ;;  %s1545_s3 = inlined_call_operand.vmem [shape: f32[128,256], index: 3, kind: input, shape index: {}]   ;;  %s1546_s7 = inlined_call_operand.vmem [shape: f32[1,128], index: 7, kind: output, shape index: {}]  }
   0x1   :  { %973 = vset.pattern.permute.xlu2 %v974_v0  ;;  %972 = vset.pattern.permute.xlu1 %v974_v0  ;;  %v68_v1 = vld [vmem:[%s1539_s2 + $0x20] sm:$0xff]  ;;  %v66_v2 = vld [vmem:[%s1539_s2 + $0x10] sm:$0xff]  ;;  %v31_v4 = vld [vmem:[%s1540_s0 + $0x18] sm:$0xff] }
   0x2   :  { %v64_v3 = vld [vmem:[%s1539_s2] sm:$0xff]  ;;  %971 = vset.pattern.permute.xlu0 %v974_v0  ;;  %118 = vperm.xlu2 %973, %v68_v1   ;;  %v30_v5 = vld [vmem:[%s1540_s0 + $0x10] sm:$0xff]  ;;  %v29_v6 = vld [vmem:[%s1540_s0 + $0x8] sm:$0xff] }
   0x3   :  { %108 = vperm.xlu1 %972, %v66_v2   ;;  %98 = vperm.xlu0 %971, %v64_v3   ;;  %v28_v7 = vld [vmem:[%s1540_s0] sm:$0xff]  ;;  %v50_v9 = vld [vmem:[%s1541_s1 + $0x90] sm:$0xff]  ;;  %v69_v10 = vld [vmem:[%s1539_s2 + $0x28] sm:$0xff] }
   0x4   :  { %365 = vmatpush.msra.mxu0 %v31_v4  ;;  %950 = vmatpush.msra.mxu3 %v31_v4  ;;  %v32_v8 = vld [vmem:[%s1541_s1] sm:$0xff]  ;;  %v67_v11 = vld [vmem:[%s1539_s2 + $0x18] sm:$0xff]  ;;  %v65_v12 = vld [vmem:[%s1539_s2 + $0x8] sm:$0xff] }
   0x5   :  { %v33_v13 = vld [vmem:[%s1541_s1 + $0x8] sm:$0xff]  ;;  %v51_v14 = vld [vmem:[%s1541_s1 + $0x98] sm:$0xff]  ;;  %v94_v15 = vld [vmem:[%s1539_s2 + $0xf0] sm:$0xff] }
   0x6   :  { %366 = vmatpush.msra.mxu0 %v30_v5  ;;  %951 = vmatpush.msra.mxu3 %v30_v5  ;;  %v95_v16 = vld [vmem:[%s1539_s2 + $0xf8] sm:$0xff]  ;;  %v70_v17 = vld [vmem:[%s1539_s2 + $0x30] sm:$0xff]  ;;  %v52_v19 = vld [vmem:[%s1541_s1 + $0xa0] sm:$0xff] }
   0x7   :  { %v34_v18 = vld [vmem:[%s1541_s1 + $0x10] sm:$0xff]  ;;  %v91_v20 = vld [vmem:[%s1539_s2 + $0xd8] sm:$0xff]  ;;  %v92_v21 = vld [vmem:[%s1539_s2 + $0xe0] sm:$0xff] }
   0x8   :  { %367 = vmatpush.msra.mxu0 %v29_v6  ;;  %952 = vmatpush.msra.mxu3 %v29_v6  ;;  %v93_v22 = vld [vmem:[%s1539_s2 + $0xe8] sm:$0xff]  ;;  %v35_v23 = vld [vmem:[%s1541_s1 + $0x18] sm:$0xff]  ;;  %v78_v25 = vld [vmem:[%s1539_s2 + $0x70] sm:$0xff] }
   0x9   :  { %v53_v24 = vld [vmem:[%s1541_s1 + $0xa8] sm:$0xff]  ;;  %v90_v26 = vld [vmem:[%s1539_s2 + $0xd0] sm:$0xff]  ;;  %v79_v27 = vld [vmem:[%s1539_s2 + $0x78] sm:$0xff] }
   0xa   :  { %368 = vmatpush.msra.mxu0 %v28_v7  ;;  %953 = vmatpush.msra.mxu3 %v28_v7  ;;  %v36_v28 = vld [vmem:[%s1541_s1 + $0x20] sm:$0xff]  ;;  %v54_v29 = vld [vmem:[%s1541_s1 + $0xb0] sm:$0xff]  ;;  %v77_v31 = vld [vmem:[%s1539_s2 + $0x68] sm:$0xff] }
   0xb   :  { %918 = vmatmul.msk.f32.vlgmr.msra.gmra.mxu0 %vm256_vm0, %v32_v8  ;;  %936 = vmatmul.msk.f32.vlgmr.msra.gmra.mxu3 %vm256_vm0, %v50_v9  ;;  %v88_v30 = vld [vmem:[%s1539_s2 + $0xc0] sm:$0xff]  ;;  %v89_v32 = vld [vmem:[%s1539_s2 + $0xc8] sm:$0xff]  ;;  %v55_v34 = vld [vmem:[%s1541_s1 + $0xb8] sm:$0xff] }
   0xc   :  { %123 = vperm.xlu2 %973, %v69_v10   ;;  %113 = vperm.xlu1 %972, %v67_v11   ;;  %v37_v33 = vld [vmem:[%s1541_s1 + $0x28] sm:$0xff]  ;;  %v75_v35 = vld [vmem:[%s1539_s2 + $0x58] sm:$0xff]  ;;  %v76_v37 = vld [vmem:[%s1539_s2 + $0x60] sm:$0xff] }
   0xd   :  { %103 = vperm.xlu0 %971, %v65_v12   ;;  %v87_v36 = vld [vmem:[%s1539_s2 + $0xb8] sm:$0xff]  ;;  %v38_v38 = vld [vmem:[%s1541_s1 + $0x30] sm:$0xff]  ;;  %v56_v39 = vld [vmem:[%s1541_s1 + $0xc0] sm:$0xff] }
   0xe   :  { %v85_v40 = vld [vmem:[%s1539_s2 + $0xa8] sm:$0xff]  ;;  %v74_v41 = vld [vmem:[%s1539_s2 + $0x50] sm:$0xff]  ;;  %v39_v43 = vld [vmem:[%s1541_s1 + $0x38] sm:$0xff] }
   0xf   :  { %v86_v42 = vld [vmem:[%s1539_s2 + $0xb0] sm:$0xff]  ;;  %v57_v44 = vld [vmem:[%s1541_s1 + $0xc8] sm:$0xff]  ;;  %v72_v45 = vld [vmem:[%s1539_s2 + $0x40] sm:$0xff] }
  0x10   :  { %v84_v46 = vld [vmem:[%s1539_s2 + $0xa0] sm:$0xff]  ;;  %v73_v47 = vld [vmem:[%s1539_s2 + $0x48] sm:$0xff]  ;;  %v58_v49 = vld [vmem:[%s1541_s1 + $0xd0] sm:$0xff] }
  0x11   :  { %v40_v48 = vld [vmem:[%s1541_s1 + $0x40] sm:$0xff]  ;;  %v82_v50 = vld [vmem:[%s1539_s2 + $0x90] sm:$0xff]  ;;  %v71_v51 = vld [vmem:[%s1539_s2 + $0x38] sm:$0xff] }
  0x12   :  { %v83_v52 = vld [vmem:[%s1539_s2 + $0x98] sm:$0xff]  ;;  %v41_v53 = vld [vmem:[%s1541_s1 + $0x48] sm:$0xff]  ;;  %v530_v55 = vld [vmem:[%s1542_s4] sm:$0xff] }
  0x13   :  { %919 = vmatmul.msk.f32.gmra.mxu0 %vm256_vm0, %v33_v13  ;;  %937 = vmatmul.msk.f32.gmra.mxu3 %vm256_vm0, %v51_v14  ;;  %v59_v54 = vld [vmem:[%s1541_s1 + $0xd8] sm:$0xff]  ;;  %v80_v56 = vld [vmem:[%s1539_s2 + $0x80] sm:$0xff]  ;;  %v81_v57 = vld [vmem:[%s1539_s2 + $0x88] sm:$0xff] }
  0x14   :  { %248 = vperm.xlu2 %973, %v94_v15   ;;  %253 = vperm.xlu1 %972, %v95_v16   ;;  %v42_v58 = vld [vmem:[%s1541_s1 + $0x50] sm:$0xff]  ;;  %v60_v59 = vld [vmem:[%s1541_s1 + $0xe0] sm:$0xff]  ;;  %v533_v60 = vld [vmem:[%s1542_s4 + $0x18] sm:$0xff] }
  0x15   :  { %128 = vperm.xlu0 %971, %v70_v17   ;;  %v532_v61 = vld [vmem:[%s1542_s4 + $0x10] sm:$0xff]  ;;  %v531_v62 = vld [vmem:[%s1542_s4 + $0x8] sm:$0xff]  ;;  %v43_v63 = vld [vmem:[%s1541_s1 + $0x58] sm:$0xff] }
  0x16   :  { %v61_v0 = vld [vmem:[%s1541_s1 + $0xe8] sm:$0xff]  ;;  %v536_v1 = vld [vmem:[%s1542_s4 + $0x30] sm:$0xff]  ;;  %v534_v3 = vld [vmem:[%s1542_s4 + $0x20] sm:$0xff] }
  0x17   :  { %v535_v2 = vld [vmem:[%s1542_s4 + $0x28] sm:$0xff]  ;;  %v44_v4 = vld [vmem:[%s1541_s1 + $0x60] sm:$0xff]  ;;  %v62_v5 = vld [vmem:[%s1541_s1 + $0xf0] sm:$0xff] }
  0x18   :  { %v539_v6 = vld [vmem:[%s1542_s4 + $0x48] sm:$0xff]  ;;  %v538_v7 = vld [vmem:[%s1542_s4 + $0x40] sm:$0xff]  ;;  %v537_v8 = vld [vmem:[%s1542_s4 + $0x38] sm:$0xff] }
  0x19   :  { %v45_v9 = vld [vmem:[%s1541_s1 + $0x68] sm:$0xff]  ;;  %v63_v10 = vld [vmem:[%s1541_s1 + $0xf8] sm:$0xff]  ;;  %v542_v11 = vld [vmem:[%s1542_s4 + $0x60] sm:$0xff] }
  0x1a   :  { %v541_v12 = vld [vmem:[%s1542_s4 + $0x58] sm:$0xff]  ;;  %v540_v13 = vld [vmem:[%s1542_s4 + $0x50] sm:$0xff]  ;;  %v543_v17 = vld [vmem:[%s1542_s4 + $0x68] sm:$0xff] }
  0x1b   :  { %920 = vmatmul.msk.f32.gmra.mxu0 %vm256_vm0, %v34_v18  ;;  %938 = vmatmul.msk.f32.gmra.mxu3 %vm256_vm0, %v52_v19  ;;  %v46_v14 = vld [vmem:[%s1541_s1 + $0x70] sm:$0xff]  ;;  %v545_v15 = vld [vmem:[%s1542_s4 + $0x78] sm:$0xff] }
  0x1c   :  { %233 = vperm.xlu2 %973, %v91_v20   ;;  %238 = vperm.xlu1 %972, %v92_v21   ;;  %v544_v16 = vld [vmem:[%s1542_s4 + $0x70] sm:$0xff]  ;;  %v47_v18 = vld [vmem:[%s1541_s1 + $0x78] sm:$0xff]  ;;  %v773_v20 = vld [vmem:[%s1543_s5 + $0x8] sm:$0xff] }
  0x1d   :  { %243 = vperm.xlu0 %971, %v93_v22   ;;  %v774_v19 = vld [vmem:[%s1543_s5 + $0x10] sm:$0xff]  ;;  %v772_v21 = vld [vmem:[%s1543_s5] sm:$0xff]  ;;  %v12_v22 = vstv %s1544_s6 }
  0x1e   :  { %13 = vst [vmem:[#allocation2] sm:$0x1] %v12_v22 }
  0x23   :  { %921 = vmatmul.msk.f32.gmra.mxu0 %vm256_vm0, %v35_v23  ;;  %939 = vmatmul.msk.f32.gmra.mxu3 %vm256_vm0, %v53_v24 }
  0x24   :  { %168 = vperm.xlu2 %973, %v78_v25   ;;  %228 = vperm.xlu1 %972, %v90_v26   ;;  %v48_v25 = vld [vmem:[%s1541_s1 + $0x80] sm:$0xff] }
  0x25   :  { %173 = vperm.xlu0 %971, %v79_v27   ;;  %v777_v27 = vld [vmem:[%s1543_s5 + $0x28] sm:$0xff] }
  0x2b   :  { %922 = vmatmul.msk.f32.gmra.mxu0 %vm256_vm0, %v36_v28  ;;  %940 = vmatmul.msk.f32.gmra.mxu3 %vm256_vm0, %v54_v29  ;;  %v776_v28 = vld [vmem:[%s1543_s5 + $0x20] sm:$0xff]  ;;  %v775_v29 = vld [vmem:[%s1543_s5 + $0x18] sm:$0xff] }
  0x2c   :  { %218 = vperm.xlu2 %973, %v88_v30   ;;  %163 = vperm.xlu1 %972, %v77_v31  }
  0x2d   :  { %223 = vperm.xlu0 %971, %v89_v32  }
  0x33   :  { %923 = vmatmul.msk.f32.gmra.mxu0 %vm256_vm0, %v37_v33  ;;  %941 = vmatmul.msk.f32.gmra.mxu3 %vm256_vm0, %v55_v34  ;;  %v49_v33 = vld [vmem:[%s1541_s1 + $0x88] sm:$0xff] }
  0x34   :  { %153 = vperm.xlu2 %973, %v75_v35   ;;  %213 = vperm.xlu1 %972, %v87_v36   ;;  %v780_v35 = vld [vmem:[%s1543_s5 + $0x40] sm:$0xff]  ;;  %v779_v36 = vld [vmem:[%s1543_s5 + $0x38] sm:$0xff] }
  0x35   :  { %158 = vperm.xlu0 %971, %v76_v37   ;;  %v778_v37 = vld [vmem:[%s1543_s5 + $0x30] sm:$0xff] }
  0x3b   :  { %924 = vmatmul.msk.f32.gmra.mxu0 %vm256_vm0, %v38_v38  ;;  %942 = vmatmul.msk.f32.gmra.mxu3 %vm256_vm0, %v56_v39 }
  0x3c   :  { %203 = vperm.xlu2 %973, %v85_v40   ;;  %148 = vperm.xlu1 %972, %v74_v41  }
  0x3d   :  { %208 = vperm.xlu0 %971, %v86_v42   ;;  %v783_v42 = vld [vmem:[%s1543_s5 + $0x58] sm:$0xff] }
  0x43   :  { %925 = vmatmul.msk.f32.gmra.mxu0 %vm256_vm0, %v39_v43  ;;  %943 = vmatmul.msk.f32.gmra.mxu3 %vm256_vm0, %v57_v44  ;;  %v782_v43 = vld [vmem:[%s1543_s5 + $0x50] sm:$0xff]  ;;  %v781_v44 = vld [vmem:[%s1543_s5 + $0x48] sm:$0xff] }
  0x44   :  { %138 = vperm.xlu2 %973, %v72_v45   ;;  %198 = vperm.xlu1 %972, %v84_v46  }
  0x45   :  { %143 = vperm.xlu0 %971, %v73_v47  }
  0x4b   :  { %926 = vmatmul.msk.f32.gmra.mxu0 %vm256_vm0, %v40_v48  ;;  %944 = vmatmul.msk.f32.gmra.mxu3 %vm256_vm0, %v58_v49  ;;  %v786_v49 = vld [vmem:[%s1543_s5 + $0x70] sm:$0xff] }
  0x4c   :  { %188 = vperm.xlu2 %973, %v82_v50   ;;  %133 = vperm.xlu1 %972, %v71_v51   ;;  %v785_v50 = vld [vmem:[%s1543_s5 + $0x68] sm:$0xff]  ;;  %v784_v51 = vld [vmem:[%s1543_s5 + $0x60] sm:$0xff] }
  0x4d   :  { %193 = vperm.xlu0 %971, %v83_v52  }
  0x53   :  { %927 = vmatmul.msk.f32.gmra.mxu0 %vm256_vm0, %v41_v53  ;;  %945 = vmatmul.msk.f32.gmra.mxu3 %vm256_vm0, %v59_v54 }
  0x54   :  { %548 = vperm.xlu2 %973, %v530_v55   ;;  %178 = vperm.xlu1 %972, %v80_v56   ;;  %v905_v55 = vld [vmem:[#allocation2] sm:$0x1]  ;;  %v787_v56 = vld [vmem:[%s1543_s5 + $0x78] sm:$0xff] }
  0x55   :  { %183 = vperm.xlu0 %971, %v81_v57  }
  0x5b   :  { %928 = vmatmul.msk.f32.gmra.mxu0 %vm256_vm0, %v42_v58  ;;  %946 = vmatmul.msk.f32.gmra.mxu3 %vm256_vm0, %v60_v59 }
  0x5c   :  { %563 = vperm.xlu2 %973, %v533_v60   ;;  %558 = vperm.xlu1 %972, %v532_v61   ;;  %v1361_v52 = vpop.permute.xlu2 %118 }
  0x5d   :  { %553 = vperm.xlu0 %971, %v531_v62  }
  0x63   :  { %929 = vmatmul.msk.f32.gmra.mxu0 %vm256_vm0, %v43_v63  ;;  %947 = vmatmul.msk.f32.gmra.mxu3 %vm256_vm0, %v61_v0 }
  0x64   :  { %578 = vperm.xlu2 %973, %v536_v1   ;;  %573 = vperm.xlu1 %972, %v535_v2  }
  0x65   :  { %568 = vperm.xlu0 %971, %v534_v3  }
  0x66   :  { %v124_v58 = vpop.permute.xlu2 %123 }
  0x6b   :  { %930 = vmatmul.msk.f32.gmra.mxu0 %vm256_vm0, %v44_v4  ;;  %948 = vmatmul.msk.f32.gmra.mxu3 %vm256_vm0, %v62_v5 }
  0x6c   :  { %593 = vperm.xlu2 %973, %v539_v6   ;;  %588 = vperm.xlu1 %972, %v538_v7  }
  0x6d   :  { %583 = vperm.xlu0 %971, %v537_v8  }
  0x6e   :  { %v249_v3 = vpop.permute.xlu2 %248 }
  0x73   :  { %931 = vmatmul.msk.f32.gmra.mxu0 %vm256_vm0, %v45_v9  ;;  %949 = vmatmul.msk.f32.gmra.mxu3 %vm256_vm0, %v63_v10 }
  0x74   :  { %608 = vperm.xlu2 %973, %v542_v11   ;;  %603 = vperm.xlu1 %972, %v541_v12  }
  0x75   :  { %598 = vperm.xlu0 %971, %v540_v13   ;;  %v99_v23 = vpop.permute.xlu0 %98  ;;  %v109_v38 = vpop.permute.xlu1 %108 }
  0x76   :  { %v234_v10 = vpop.permute.xlu2 %233 }
  0x7b   :  { %932 = vmatmul.msk.f32.gmra.mxu0 %vm256_vm0, %v46_v14 }
  0x7c   :  { %623 = vperm.xlu2 %973, %v545_v15   ;;  %618 = vperm.xlu1 %972, %v544_v16  }
  0x7d   :  { %613 = vperm.xlu0 %971, %v543_v17  }
  0x7e   :  { %v114_v46 = vpop.permute.xlu1 %113  ;;  %v169_v15 = vpop.permute.xlu2 %168 }
  0x7f   :  { %v104_v31 = vpop.permute.xlu0 %103 }
  0x83   :  { %933 = vmatmul.msk.f32.gmra.mxu0 %vm256_vm0, %v47_v18 }
  0x84   :  { %800 = vperm.xlu2 %973, %v774_v19   ;;  %795 = vperm.xlu1 %972, %v773_v20  }
  0x85   :  { %790 = vperm.xlu0 %971, %v772_v21  }
  0x86   :  { %v254_v2 = vpop.permute.xlu1 %253  ;;  %v219_v20 = vpop.permute.xlu2 %218 }
  0x87   :  { %v1380_v1 = vpop.permute.xlu0 %128 }
  0x88   :  { %v370_v24 = vpop.f32.mrf.mxu0 }
  0x89   :  { %v1306_v26 = vadd.f32 %v370_v24, %v99_v23 }
  0x8b   :  { %934 = vmatmul.msk.f32.gmra.mxu0 %vm256_vm0, %v48_v25 }
  0x8c   :  { %815 = vperm.xlu2 %973, %v777_v27   ;;  %810 = vperm.xlu1 %972, %v776_v28  }
  0x8d   :  { %805 = vperm.xlu0 %971, %v775_v29  }
  0x8e   :  { %v1318_v30 = vpop.f32.mrf.mxu3  ;;  %v239_v7 = vpop.permute.xlu1 %238 }
  0x8f   :  { %v244_v6 = vpop.permute.xlu0 %243  ;;  %v154_v25 = vpop.permute.xlu2 %153 }
  0x90   :  { %v373_v32 = vpop.f32.mrf.mxu0 }
  0x91   :  { %v1323_v34 = vadd.f32 %v373_v32, %v104_v31 }
  0x93   :  { %935 = vmatmul.msk.f32.gmra.mxu0 %vm256_vm0, %v49_v33 }
  0x94   :  { %830 = vperm.xlu2 %973, %v780_v35   ;;  %825 = vperm.xlu1 %972, %v779_v36  }
  0x95   :  { %820 = vperm.xlu0 %971, %v778_v37  }
  0x96   :  { %v1335_v39 = vpop.f32.mrf.mxu3  ;;  %v229_v12 = vpop.permute.xlu1 %228 }
  0x97   :  { %v174_v11 = vpop.permute.xlu0 %173  ;;  %v204_v37 = vpop.permute.xlu2 %203 }
  0x98   :  { %v376_v40 = vpop.f32.mrf.mxu0 }
  0x99   :  { %v1337_v41 = vadd.f32 %v376_v40, %v109_v38 }
  0x9c   :  { %845 = vperm.xlu2 %973, %v783_v42   ;;  %840 = vperm.xlu1 %972, %v782_v43  }
  0x9d   :  { %835 = vperm.xlu0 %971, %v781_v44  }
  0x9e   :  { %v1348_v45 = vpop.f32.mrf.mxu3  ;;  %v164_v19 = vpop.permute.xlu1 %163 }
  0x9f   :  { %v224_v16 = vpop.permute.xlu0 %223 }
  0xa0   :  { %v379_v47 = vpop.f32.mrf.mxu0 }
  0xa1   :  { %v1350_v48 = vadd.f32 %v379_v47, %v114_v46 }
  0xa4   :  { %860 = vperm.xlu2 %973, %v786_v49   ;;  %855 = vperm.xlu1 %972, %v785_v50  }
  0xa5   :  { %850 = vperm.xlu0 %971, %v784_v51  }
  0xa6   :  { %v1363_v53 = vpop.f32.mrf.mxu3  ;;  %v214_v24 = vpop.permute.xlu1 %213 }
  0xa7   :  { %v159_v23 = vpop.permute.xlu0 %158 }
  0xa8   :  { %v1365_v54 = vpop.f32.mrf.mxu0 }
  0xac   :  { %908 = vperm.xlu1 %972, %v905_v55  }
  0xad   :  { %865 = vperm.xlu0 %971, %v787_v56  }
  0xae   :  { %v1370_v57 = vpop.f32.mrf.mxu3  ;;  %v149_v31 = vpop.permute.xlu1 %148 }
  0xaf   :  { %v209_v29 = vpop.permute.xlu0 %208 }
  0xb0   :  { %v385_v59 = vpop.f32.mrf.mxu0 }
  0xb1   :  { %v1372_v60 = vadd.f32 %v385_v59, %v124_v58 }
  0xb6   :  { %v1374_v61 = vpop.f32.mrf.mxu3  ;;  %v199_v49 = vpop.permute.xlu1 %198 }
  0xb7   :  { %v144_v44 = vpop.permute.xlu0 %143 }
  0xb8   :  { %v1376_v62 = vpop.f32.mrf.mxu0 }
  0xbe   :  { %v442_v63 = vpop.f32.mrf.mxu3 }
  0xc0   :  { %v1378_v0 = vpop.f32.mrf.mxu0 }
  0xc6   :  { %v445_v4 = vpop.f32.mrf.mxu3 }
  0xc7   :  { %v446_v59 = vadd.f32 %v445_v4, %v224_v16  ;;  %v437_v4 = vadd.f32 %v1370_v57, %v209_v29  ;;  %v431_v57 = vadd.f32 %v1348_v45, %v199_v49 }
  0xc8   :  { %v1382_v5 = vpop.f32.mrf.mxu0 }
  0xce   :  { %v448_v8 = vpop.f32.mrf.mxu3 }
  0xcf   :  { %v449_v50 = vadd.f32 %v448_v8, %v229_v12  ;;  %v440_v8 = vadd.f32 %v1374_v61, %v214_v24  ;;  %v491_v12 = vmax.f32 %v446_v59, 0.0  ;;  %v434_v61 = vadd.f32 %v1363_v53, %v204_v37  ;;  %v504_v59 = vld [vmem:[%s1545_s3 + $0x30] sm:$0xff] }
  0xd0   :  { %v1384_v9 = vpop.f32.mrf.mxu0 }
  0xd6   :  { %v451_v13 = vpop.f32.mrf.mxu3 }
  0xd7   :  { %v452_v46 = vadd.f32 %v451_v13, %v234_v10  ;;  %v194_v13 = vpop.permute.xlu0 %193 }
  0xd8   :  { %v1386_v14 = vpop.f32.mrf.mxu0  ;;  %v428_v53 = vadd.f32 %v1335_v39, %v194_v13  ;;  %v519_v13 = vld [vmem:[%s1545_s3 + $0xa8] sm:$0xff] }
  0xde   :  { %v454_v17 = vpop.f32.mrf.mxu3 }
  0xdf   :  { %v455_v42 = vadd.f32 %v454_v17, %v239_v7  ;;  %v443_v7 = vadd.f32 %v442_v63, %v219_v20  ;;  %v492_v17 = vmax.f32 %v449_v50, 0.0  ;;  %v401_v20 = vadd.f32 %v1386_v14, %v149_v31  ;;  %v501_v50 = vld [vmem:[%s1545_s3 + $0x18] sm:$0xff] }
  0xe0   :  { %v403_v18 = vpop.f32.mrf.mxu0  ;;  %v487_v31 = vmax.f32 %v434_v61, 0.0  ;;  %v525_v61 = vld [vmem:[%s1545_s3 + $0xd8] sm:$0xff] }
  0xe1   :  { %v494_v51 = vmax.f32 %v455_v42, 0.0  ;;  %v490_v16 = vmax.f32 %v443_v7, 0.0  ;;  %v476_v14 = vmax.f32 %v401_v20, 0.0  ;;  %v513_v7 = vld [vmem:[%s1545_s3 + $0x78] sm:$0xff] }
  0xe6   :  { %v457_v21 = vpop.f32.mrf.mxu3 }
  0xe7   :  { %v458_v38 = vadd.f32 %v457_v21, %v244_v6 }
  0xe8   :  { %v406_v22 = vpop.f32.mrf.mxu0 }
  0xe9   :  { %v495_v47 = vmax.f32 %v458_v38, 0.0  ;;  %v485_v38 = vmax.f32 %v428_v53, 0.0 }
  0xee   :  { %v460_v27 = vpop.f32.mrf.mxu3 }
  0xef   :  { %v461_v33 = vadd.f32 %v460_v27, %v249_v3  ;;  %v493_v3 = vmax.f32 %v452_v46, 0.0  ;;  %v407_v27 = vadd.f32 %v406_v22, %v159_v23  ;;  %v489_v23 = vmax.f32 %v440_v8, 0.0  ;;  %v517_v8 = vld [vmem:[%s1545_s3 + $0x98] sm:$0xff] }
  0xf0   :  { %v409_v28 = vpop.f32.mrf.mxu0 }
  0xf1   :  { %v496_v43 = vmax.f32 %v461_v33, 0.0  ;;  %v410_v6 = vadd.f32 %v409_v28, %v164_v19  ;;  %v134_v19 = vpop.permute.xlu1 %133  ;;  %v478_v22 = vmax.f32 %v407_v27, 0.0  ;;  %v515_v27 = vld [vmem:[%s1545_s3 + $0x88] sm:$0xff] }
  0xf6   :  { %v463_v32 = vpop.f32.mrf.mxu3 }
  0xf7   :  { %v464_v36 = vadd.f32 %v463_v32, %v254_v2  ;;  %v139_v2 = vpop.permute.xlu2 %138  ;;  %v392_v32 = vadd.f32 %v1378_v0, %v134_v19 }
  0xf8   :  { %v412_v35 = vpop.f32.mrf.mxu0  ;;  %v395_v29 = vadd.f32 %v1382_v5, %v139_v2  ;;  %v389_v5 = vadd.f32 %v1376_v62, %v1380_v1  ;;  %v471_v1 = vmax.f32 %v1372_v60, 0.0  ;;  %v467_v60 = vmax.f32 %v1323_v34, 0.0  ;;  %v503_v34 = vld [vmem:[%s1545_s3 + $0x28] sm:$0xff]  ;;  %v506_v2 = vld [vmem:[%s1545_s3 + $0x40] sm:$0xff] }
  0xf9   :  { %v497_v40 = vmax.f32 %v464_v36, 0.0  ;;  %v413_v56 = vadd.f32 %v412_v35, %v169_v15  ;;  %v404_v15 = vadd.f32 %v403_v18, %v154_v25  ;;  %v398_v18 = vadd.f32 %v1384_v9, %v144_v44  ;;  %v184_v36 = vpop.permute.xlu0 %183  ;;  %v179_v0 = vpop.permute.xlu1 %178 }
  0xfa   :  { %v488_v25 = vmax.f32 %v437_v4, 0.0  ;;  %v486_v35 = vmax.f32 %v431_v57, 0.0  ;;  %v474_v37 = vmax.f32 %v395_v29, 0.0  ;;  %v472_v44 = vmax.f32 %v389_v5, 0.0  ;;  %v518_v4 = vld [vmem:[%s1545_s3 + $0xa0] sm:$0xff]  ;;  %v527_v57 = vld [vmem:[%s1545_s3 + $0xe8] sm:$0xff] }
  0xfb   :  { %691 = vmatpush.msra.mxu2 %v497_v40  ;;  %v480_v10 = vmax.f32 %v413_v56, 0.0  ;;  %v477_v24 = vmax.f32 %v404_v15, 0.0  ;;  %v475_v9 = vmax.f32 %v398_v18, 0.0  ;;  %v473_v40 = vmax.f32 %v392_v32, 0.0  ;;  %v502_v56 = vld [vmem:[%s1545_s3 + $0x20] sm:$0xff]  ;;  %v516_v15 = vld [vmem:[%s1545_s3 + $0x90] sm:$0xff] }
  0xfc   :  { %v526_v32 = vld [vmem:[%s1545_s3 + $0xe0] sm:$0xff] }
  0xfd   :  { %692 = vmatpush.msra.mxu2 %v496_v43 }
  0xff   :  { %693 = vmatpush.msra.mxu2 %v495_v47  ;;  %v189_v28 = vpop.permute.xlu2 %188  ;;  %v499_v47 = vld [vmem:[%s1545_s3 + $0x8] sm:$0xff] }
 0x100   :  { %v415_v55 = vpop.f32.mrf.mxu0  ;;  %v425_v33 = vadd.f32 %v1318_v30, %v189_v28  ;;  %v383_v30 = vadd.f32 %v1365_v54, %v1361_v52  ;;  %v469_v52 = vmax.f32 %v1350_v48, 0.0  ;;  %v468_v54 = vmax.f32 %v1337_v41, 0.0  ;;  %v498_v48 = vld [vmem:[%s1545_s3] sm:$0xff]  ;;  %v528_v41 = vld [vmem:[%s1545_s3 + $0xf0] sm:$0xff] }
 0x101   :  { %v416_v58 = vadd.f32 %v415_v55, %v174_v11  ;;  %694 = vmatpush.msra.mxu2 %v494_v51  ;;  %v479_v11 = vmax.f32 %v410_v6, 0.0  ;;  %v466_v51 = vmax.f32 %v1306_v26, 0.0  ;;  %v500_v26 = vld [vmem:[%s1545_s3 + $0x10] sm:$0xff]  ;;  %v505_v55 = vld [vmem:[%s1545_s3 + $0x38] sm:$0xff]  ;;  %v511_v6 = vld [vmem:[%s1545_s3 + $0x68] sm:$0xff]  ;;  %v559_v20 = vpop.permute.xlu1 %558 }
 0x102   :  { %v484_v42 = vmax.f32 %v425_v33, 0.0  ;;  %v470_v49 = vmax.f32 %v383_v30, 0.0  ;;  %v524_v28 = vld [vmem:[%s1545_s3 + $0xd0] sm:$0xff] }
 0x103   :  { %v481_v21 = vmax.f32 %v416_v58, 0.0  ;;  %695 = vmatpush.msra.mxu2 %v493_v3  ;;  %v507_v58 = vld [vmem:[%s1545_s3 + $0x48] sm:$0xff]  ;;  %v509_v3 = vld [vmem:[%s1545_s3 + $0x58] sm:$0xff] }
 0x105   :  { %626 = vmatpush.msra.mxu1 %v481_v21  ;;  %954 = vmatpush.msrb.mxu3 %v481_v21  ;;  %v508_v21 = vld [vmem:[%s1545_s3 + $0x50] sm:$0xff] }
 0x106   :  { %696 = vmatpush.msra.mxu2 %v492_v17  ;;  %v510_v17 = vld [vmem:[%s1545_s3 + $0x60] sm:$0xff] }
 0x107   :  { %627 = vmatpush.msra.mxu1 %v480_v10  ;;  %955 = vmatpush.msrb.mxu3 %v480_v10  ;;  %v512_v10 = vld [vmem:[%s1545_s3 + $0x70] sm:$0xff]  ;;  %v549_v19 = vpop.permute.xlu2 %548 }
 0x108   :  { %697 = vmatpush.msra.mxu2 %v491_v12  ;;  %v418_v63 = vpop.f32.mrf.mxu0  ;;  %v514_v12 = vld [vmem:[%s1545_s3 + $0x80] sm:$0xff] }
 0x109   :  { %628 = vmatpush.msra.mxu1 %v479_v11  ;;  %956 = vmatpush.msrb.mxu3 %v479_v11  ;;  %v419_v43 = vadd.f32 %v418_v63, %v179_v0  ;;  %v521_v11 = vld [vmem:[%s1545_s3 + $0xb8] sm:$0xff]  ;;  %v520_v63 = vld [vmem:[%s1545_s3 + $0xb0] sm:$0xff] }
 0x10a   :  { %698 = vmatpush.msra.mxu2 %v490_v16  ;;  %v523_v16 = vld [vmem:[%s1545_s3 + $0xc8] sm:$0xff] }
 0x10b   :  { %629 = vmatpush.msra.mxu1 %v478_v22  ;;  %957 = vmatpush.msrb.mxu3 %v478_v22  ;;  %v482_v46 = vmax.f32 %v419_v43, 0.0  ;;  %v554_v22 = vpop.permute.xlu0 %553 }
 0x10c   :  { %699 = vmatpush.msra.mxu2 %v489_v23  ;;  %v522_v23 = vld [vmem:[%s1545_s3 + $0xc0] sm:$0xff] }
 0x10d   :  { %630 = vmatpush.msra.mxu1 %v477_v24  ;;  %958 = vmatpush.msrb.mxu3 %v477_v24  ;;  %v1491_v24 = vpop.permute.xlu1 %573 }
 0x10e   :  { %700 = vmatpush.msra.mxu2 %v488_v25 }
 0x10f   :  { %631 = vmatpush.msra.mxu1 %v476_v14  ;;  %959 = vmatpush.msrb.mxu3 %v476_v14  ;;  %v564_v18 = vpop.permute.xlu2 %563  ;;  %v529_v14 = vld [vmem:[%s1545_s3 + $0xf8] sm:$0xff] }
 0x110   :  { %701 = vmatpush.msra.mxu2 %v487_v31  ;;  %v421_v45 = vpop.f32.mrf.mxu0 }
 0x111   :  { %632 = vmatpush.msra.mxu1 %v475_v9  ;;  %960 = vmatpush.msrb.mxu3 %v475_v9  ;;  %v422_v39 = vadd.f32 %v421_v45, %v184_v36 }
 0x112   :  { %702 = vmatpush.msra.mxu2 %v486_v35 }
 0x113   :  { %633 = vmatpush.msra.mxu1 %v474_v37  ;;  %961 = vmatpush.msrb.mxu3 %v474_v37  ;;  %v483_v62 = vmax.f32 %v422_v39, 0.0  ;;  %v569_v25 = vpop.permute.xlu0 %568 }
 0x114   :  { %703 = vmatpush.msra.mxu2 %v485_v38 }
 0x115   :  { %634 = vmatpush.msra.mxu1 %v473_v40  ;;  %962 = vmatpush.msrb.mxu3 %v473_v40  ;;  %v1504_v31 = vpop.permute.xlu1 %588 }
 0x116   :  { %704 = vmatpush.msra.mxu2 %v484_v42 }
 0x117   :  { %635 = vmatpush.msra.mxu1 %v472_v44  ;;  %963 = vmatpush.msrb.mxu3 %v472_v44  ;;  %v1499_v29 = vpop.permute.xlu2 %578 }
 0x118   :  { %705 = vmatpush.msra.mxu2 %v483_v62 }
 0x119   :  { %636 = vmatpush.msra.mxu1 %v471_v1  ;;  %964 = vmatpush.msrb.mxu3 %v471_v1 }
 0x11a   :  { %706 = vmatpush.msra.mxu2 %v482_v46 }
 0x11b   :  { %707 = vmatmul.f32.vlgmr.msra.gmra.mxu2 %v499_v47  ;;  %637 = vmatpush.msra.mxu1 %v470_v49  ;;  %v1506_v53 = vpop.permute.xlu0 %583 }
 0x11c   :  { %965 = vmatpush.msrb.mxu3 %v470_v49 }
 0x11d   :  { %638 = vmatpush.msra.mxu1 %v469_v52  ;;  %v1513_v33 = vpop.permute.xlu1 %603 }
 0x11e   :  { %966 = vmatpush.msrb.mxu3 %v469_v52 }
 0x11f   :  { %639 = vmatpush.msra.mxu1 %v468_v54  ;;  %v1511_v9 = vpop.permute.xlu2 %593 }
 0x120   :  { %967 = vmatpush.msrb.mxu3 %v468_v54 }
 0x121   :  { %640 = vmatpush.msra.mxu1 %v467_v60 }
 0x122   :  { %968 = vmatpush.msrb.mxu3 %v467_v60 }
 0x123   :  { %710 = vmatmul.f32.gmra.mxu2 %v501_v50  ;;  %641 = vmatpush.msra.mxu1 %v466_v51  ;;  %v1515_v35 = vpop.permute.xlu0 %598 }
 0x124   :  { %969 = vmatpush.msrb.mxu3 %v466_v51  ;;  %642 = vmatmul.f32.vlgmr.msra.gmra.mxu1 %v498_v48 }
 0x125   :  { %687 = vmatmul.f32.vlgmr.msrb.gmra.mxu3 %v528_v41  ;;  %v1519_v39 = vpop.permute.xlu1 %618 }
 0x127   :  { %v1517_v37 = vpop.permute.xlu2 %608 }
 0x12b   :  { %713 = vmatmul.f32.gmra.mxu2 %v503_v34  ;;  %v1521_v40 = vpop.permute.xlu0 %613 }
 0x12c   :  { %645 = vmatmul.f32.gmra.mxu1 %v500_v26 }
 0x12d   :  { %v796_v47 = vpop.permute.xlu1 %795 }
 0x12f   :  { %v1523_v62 = vpop.permute.xlu2 %623 }
 0x133   :  { %716 = vmatmul.f32.gmra.mxu2 %v505_v55  ;;  %v791_v49 = vpop.permute.xlu0 %790 }
 0x134   :  { %648 = vmatmul.f32.gmra.mxu1 %v502_v56 }
 0x137   :  { %v801_v26 = vpop.permute.xlu2 %800 }
 0x13b   :  { %719 = vmatmul.f32.gmra.mxu2 %v507_v58 }
 0x13c   :  { %651 = vmatmul.f32.gmra.mxu1 %v504_v59 }
 0x143   :  { %722 = vmatmul.f32.gmra.mxu2 %v509_v3 }
 0x144   :  { %654 = vmatmul.f32.gmra.mxu1 %v506_v2 }
 0x14b   :  { %725 = vmatmul.f32.gmra.mxu2 %v511_v6 }
 0x14c   :  { %657 = vmatmul.f32.gmra.mxu1 %v508_v21  ;;  %v806_v21 = vpop.permute.xlu0 %805 }
 0x153   :  { %728 = vmatmul.f32.gmra.mxu2 %v513_v7 }
 0x154   :  { %660 = vmatmul.f32.gmra.mxu1 %v510_v17 }
 0x15b   :  { %731 = vmatmul.f32.gmra.mxu2 %v515_v27 }
 0x15c   :  { %663 = vmatmul.f32.gmra.mxu1 %v512_v10 }
 0x163   :  { %734 = vmatmul.f32.gmra.mxu2 %v517_v8 }
 0x164   :  { %666 = vmatmul.f32.gmra.mxu1 %v514_v12 }
 0x16b   :  { %737 = vmatmul.f32.gmra.mxu2 %v519_v13 }
 0x16c   :  { %669 = vmatmul.f32.gmra.mxu1 %v516_v15  ;;  %v811_v15 = vpop.permute.xlu1 %810 }
 0x173   :  { %740 = vmatmul.f32.gmra.mxu2 %v521_v11 }
 0x174   :  { %672 = vmatmul.f32.gmra.mxu1 %v518_v4 }
 0x17b   :  { %743 = vmatmul.f32.gmra.mxu2 %v523_v16 }
 0x17c   :  { %675 = vmatmul.f32.gmra.mxu1 %v520_v63 }
 0x183   :  { %746 = vmatmul.f32.gmra.mxu2 %v525_v61 }
 0x184   :  { %678 = vmatmul.f32.gmra.mxu1 %v522_v23 }
 0x18b   :  { %749 = vmatmul.f32.gmra.mxu2 %v527_v57 }
 0x18c   :  { %681 = vmatmul.f32.gmra.mxu1 %v524_v28 }
 0x193   :  { %752 = vmatmul.f32.gmra.mxu2 %v529_v14 }
 0x194   :  { %684 = vmatmul.f32.gmra.mxu1 %v526_v32 }
 0x19e   :  { %v708_v45 = vpop.f32.mrf.mxu2 }
 0x1a1   :  { %v643_v5 = vpop.f32.mrf.mxu1 }
 0x1a2   :  { %v644_v36 = vadd.f32 %v643_v5, %v549_v19 }
 0x1a4   :  { %v709_v38 = vadd.f32 %v708_v45, %v644_v36  ;;  %v816_v45 = vpop.permute.xlu2 %815 }
 0x1a6   :  { %v711_v0 = vpop.f32.mrf.mxu2  ;;  %v756_v30 = vmax.f32 %v709_v38, 0.0 }
 0x1a8   :  { %v868_v52 = vmul.f32 %v791_v49, %v756_v30 }
 0x1a9   :  { %v646_v42 = vpop.f32.mrf.mxu1 }
 0x1aa   :  { %v647_v43 = vadd.f32 %v646_v42, %v554_v22 }
 0x1ac   :  { %v712_v44 = vadd.f32 %v711_v0, %v647_v43  ;;  %v821_v0 = vpop.permute.xlu0 %820 }
 0x1ae   :  { %v757_v1 = vmax.f32 %v712_v44, 0.0  ;;  %v714_v46 = vpop.f32.mrf.mxu2 }
 0x1b0   :  { %v869_v54 = vmul.f32 %v796_v47, %v757_v1  ;;  %v826_v1 = vpop.permute.xlu1 %825 }
 0x1b1   :  { %v649_v60 = vpop.f32.mrf.mxu1 }
 0x1b2   :  { %v884_v50 = vadd.f32 %v869_v54, %v868_v52  ;;  %v650_v51 = vadd.f32 %v649_v60, %v559_v20 }
 0x1b4   :  { %v715_v48 = vadd.f32 %v714_v46, %v650_v51 }
 0x1b6   :  { %v758_v41 = vmax.f32 %v715_v48, 0.0  ;;  %v717_v34 = vpop.f32.mrf.mxu2 }
 0x1b8   :  { %v870_v55 = vmul.f32 %v801_v26, %v758_v41 }
 0x1b9   :  { %v652_v56 = vpop.f32.mrf.mxu1 }
 0x1ba   :  { %v885_v58 = vadd.f32 %v884_v50, %v870_v55  ;;  %v653_v59 = vadd.f32 %v652_v56, %v564_v18 }
 0x1bc   :  { %v718_v3 = vadd.f32 %v717_v34, %v653_v59  ;;  %v836_v34 = vpop.permute.xlu0 %835 }
 0x1be   :  { %v759_v2 = vmax.f32 %v718_v3, 0.0  ;;  %v720_v6 = vpop.f32.mrf.mxu2 }
 0x1c0   :  { %v871_v7 = vmul.f32 %v806_v21, %v759_v2  ;;  %v841_v2 = vpop.permute.xlu1 %840 }
 0x1c1   :  { %v655_v17 = vpop.f32.mrf.mxu1 }
 0x1c2   :  { %v886_v27 = vadd.f32 %v885_v58, %v871_v7  ;;  %v656_v10 = vadd.f32 %v655_v17, %v569_v25 }
 0x1c4   :  { %v721_v8 = vadd.f32 %v720_v6, %v656_v10 }
 0x1c6   :  { %v760_v12 = vmax.f32 %v721_v8, 0.0  ;;  %v723_v13 = vpop.f32.mrf.mxu2 }
 0x1c8   :  { %v872_v11 = vmul.f32 %v811_v15, %v760_v12 }
 0x1c9   :  { %v658_v4 = vpop.f32.mrf.mxu1 }
 0x1ca   :  { %v887_v16 = vadd.f32 %v886_v27, %v872_v11  ;;  %v659_v25 = vadd.f32 %v658_v4, %v1491_v24 }
 0x1cc   :  { %v724_v38 = vadd.f32 %v723_v13, %v659_v25 }
 0x1ce   :  { %v726_v63 = vpop.f32.mrf.mxu2  ;;  %v761_v46 = vmax.f32 %v724_v38, 0.0 }
 0x1d0   :  { %v873_v50 = vmul.f32 %v816_v45, %v761_v46 }
 0x1d1   :  { %v661_v19 = vpop.f32.mrf.mxu1 }
 0x1d2   :  { %v662_v5 = vadd.f32 %v661_v19, %v1499_v29  ;;  %v831_v29 = vpop.permute.xlu2 %830  ;;  %v888_v58 = vadd.f32 %v887_v16, %v873_v50  ;;  %v851_v16 = vpop.permute.xlu0 %850 }
 0x1d4   :  { %v727_v43 = vadd.f32 %v726_v63, %v662_v5 }
 0x1d6   :  { %v729_v20 = vpop.f32.mrf.mxu2  ;;  %v762_v52 = vmax.f32 %v727_v43, 0.0 }
 0x1d8   :  { %v874_v41 = vmul.f32 %v821_v0, %v762_v52 }
 0x1d9   :  { %v664_v22 = vpop.f32.mrf.mxu1 }
 0x1da   :  { %v665_v42 = vadd.f32 %v664_v22, %v1506_v53  ;;  %v889_v6 = vadd.f32 %v888_v58, %v874_v41  ;;  %v846_v13 = vpop.permute.xlu2 %845 }
 0x1dc   :  { %v730_v47 = vadd.f32 %v729_v20, %v665_v42 }
 0x1de   :  { %v732_v61 = vpop.f32.mrf.mxu2  ;;  %v763_v51 = vmax.f32 %v730_v47, 0.0 }
 0x1e1   :  { %v667_v23 = vpop.f32.mrf.mxu1 }
 0x1e2   :  { %v668_v30 = vadd.f32 %v667_v23, %v1504_v31  ;;  %v861_v38 = vpop.permute.xlu2 %860 }
 0x1e4   :  { %v733_v24 = vadd.f32 %v732_v61, %v668_v30  ;;  %v688_v61 = vpop.f32.mrf.mxu3 }
 0x1e5   :  { %v689_v25 = vadd.f32 %v688_v61, %v1523_v62 }
 0x1e6   :  { %v735_v18 = vpop.f32.mrf.mxu2  ;;  %v764_v31 = vmax.f32 %v733_v24, 0.0 }
 0x1e8   :  { %v876_v21 = vmul.f32 %v831_v29, %v764_v31 }
 0x1e9   :  { %v670_v57 = vpop.f32.mrf.mxu1 }
 0x1ea   :  { %v671_v49 = vadd.f32 %v670_v57, %v1511_v9  ;;  %v875_v9 = vmul.f32 %v826_v1, %v763_v51 }
 0x1ec   :  { %v736_v48 = vadd.f32 %v735_v18, %v671_v49 }
 0x1ee   :  { %v738_v28 = vpop.f32.mrf.mxu2  ;;  %v765_v59 = vmax.f32 %v736_v48, 0.0 }
 0x1f0   :  { %v877_v10 = vmul.f32 %v836_v34, %v765_v59 }
 0x1f1   :  { %v673_v14 = vpop.f32.mrf.mxu1 }
 0x1f2   :  { %v674_v60 = vadd.f32 %v673_v14, %v1515_v35 }
 0x1f4   :  { %v739_v26 = vadd.f32 %v738_v28, %v674_v60 }
 0x1f6   :  { %v741_v32 = vpop.f32.mrf.mxu2  ;;  %v766_v7 = vmax.f32 %v739_v26, 0.0 }
 0x1f9   :  { %v676_v36 = vpop.f32.mrf.mxu1 }
 0x1fa   :  { %v677_v53 = vadd.f32 %v676_v36, %v1513_v33  ;;  %v890_v33 = vadd.f32 %v889_v6, %v875_v9 }
 0x1fc   :  { %v742_v3 = vadd.f32 %v741_v32, %v677_v53  ;;  %v891_v15 = vadd.f32 %v890_v33, %v876_v21 }
 0x1fe   :  { %v744_v44 = vpop.f32.mrf.mxu2  ;;  %v767_v8 = vmax.f32 %v742_v3, 0.0  ;;  %v892_v63 = vadd.f32 %v891_v15, %v877_v10 }
 0x200   :  { %v879_v19 = vmul.f32 %v846_v13, %v767_v8 }
 0x201   :  { %v679_v54 = vpop.f32.mrf.mxu1 }
 0x202   :  { %v680_v55 = vadd.f32 %v679_v54, %v1517_v37  ;;  %v878_v37 = vmul.f32 %v841_v2, %v766_v7 }
 0x204   :  { %v745_v17 = vadd.f32 %v744_v44, %v680_v55  ;;  %v893_v23 = vadd.f32 %v892_v63, %v878_v37  ;;  %v866_v44 = vpop.permute.xlu0 %865 }
 0x206   :  { %v747_v56 = vpop.f32.mrf.mxu2  ;;  %v768_v11 = vmax.f32 %v745_v17, 0.0  ;;  %v894_v28 = vadd.f32 %v893_v23, %v879_v19 }
 0x208   :  { %v880_v18 = vmul.f32 %v851_v16, %v768_v11 }
 0x209   :  { %v682_v35 = vpop.f32.mrf.mxu1 }
 0x20a   :  { %v683_v27 = vadd.f32 %v682_v35, %v1521_v40  ;;  %v856_v40 = vpop.permute.xlu1 %855  ;;  %v895_v45 = vadd.f32 %v894_v28, %v880_v18 }
 0x20c   :  { %v748_v12 = vadd.f32 %v747_v56, %v683_v27 }
 0x20e   :  { %v750_v4 = vpop.f32.mrf.mxu2  ;;  %v769_v20 = vmax.f32 %v748_v12, 0.0 }
 0x210   :  { %v881_v14 = vmul.f32 %v856_v40, %v769_v20 }
 0x211   :  { %v685_v22 = vpop.f32.mrf.mxu1 }
 0x212   :  { %v686_v57 = vadd.f32 %v685_v22, %v1519_v39  ;;  %v896_v42 = vadd.f32 %v895_v45, %v881_v14  ;;  %v909_v24 = vpop.permute.xlu1 %908 }
 0x213   :  { %v911_v29 = vperm.slane %v909_v24, 0 }
 0x214   :  { %v751_v32 = vadd.f32 %v750_v4, %v686_v57 }
 0x216   :  { %v770_v5 = vmax.f32 %v751_v32, 0.0  ;;  %v753_v36 = vpop.f32.mrf.mxu2 }
 0x217   :  { %v754_v0 = vadd.f32 %v753_v36, %v689_v25 }
 0x218   :  { %v882_v43 = vmul.f32 %v861_v38, %v770_v5 }
 0x219   :  { %v771_v30 = vmax.f32 %v754_v0, 0.0 }
 0x21a   :  { %v897_v1 = vadd.f32 %v896_v42, %v882_v43 }
 0x21b   :  { %v883_v46 = vmul.f32 %v866_v44, %v771_v30 }
 0x21d   :  { %v898_v47 = vadd.f32 %v897_v1, %v883_v46 }
 0x21f   :  { %v899_v49 = vrot.slane %v898_v47, 4 }
 0x221   :  { %v900_v39 = vadd.f32 %v899_v49, %v898_v47 }
 0x223   :  { %v901_v52 = vrot.slane %v900_v39, 2 }
 0x225   :  { %v902_v54 = vadd.f32 %v901_v52, %v900_v39 }
 0x227   :  { %v903_v60 = vrot.slane %v902_v54, 1 }
 0x229   :  { %v904_v62 = vadd.f32 %v903_v60, %v902_v54 }
 0x22b   :  { %v912_v50 = vadd.f32 %v911_v29, %v904_v62 }
 0x22d   :  { %913 = vst [vmem:[%s1546_s7] sm:$0x1] %v912_v50 }

</bundles_post_ra>
